<compile_context>
chip_gen: v7x
topology: tpu7x:2x2x1
jax: 0.10.0
libtpu: 0.0.40
codegen_flags: <defaults>
</compile_context>

<pallas_src>
import functools
import math

import jax
import jax.numpy as jnp
from jax.experimental import pallas as pl
from jax.experimental.pallas import tpu as pltpu


def _flash_proj_kernel(xq_ref, xkv_ref, wq_ref, bq_ref, wkv_ref, bkv_ref,
                       ctx_ref,
                       q_sc, k_cache, v_cache, m_sc, l_sc, acc_sc,
                       *, tk, d_k):
    qi = pl.program_id(2)
    ki = pl.program_id(3)
    nkv = pl.num_programs(3)

    # Contract the shared feature axis: (rows, D) x (cols, D) -> (rows, cols).
    dn = (((1,), (1,)), ((), ()))

    row = pl.multiple_of(ki * tk, tk)

    # First q tile of this (batch, head): project K/V for kv-tile `ki` (fused
    # 2*d_k-wide matmul) and cache it in VMEM for all later q tiles.
    @pl.when(qi == 0)
    def _():
        kv = jax.lax.dot_general(xkv_ref[0], wkv_ref[0], dn,
                                 preferred_element_type=jnp.float32)
        kv = (kv + bkv_ref[0]).astype(k_cache.dtype)          # (tk, 2*d_k)
        k_cache[pl.ds(row, tk), :] = kv[:, :d_k]
        v_cache[pl.ds(row, tk), :] = kv[:, d_k:]

    # First kv tile: reset online-softmax state and project (pre-scaled) Q once.
    @pl.when(ki == 0)
    def _():
        m_sc[...] = jnp.full_like(m_sc, -jnp.inf)
        l_sc[...] = jnp.zeros_like(l_sc)
        acc_sc[...] = jnp.zeros_like(acc_sc)
        q = jax.lax.dot_general(xq_ref[0], wq_ref[0], dn,
                                preferred_element_type=jnp.float32)
        q_sc[...] = (q + bq_ref[0]).astype(q_sc.dtype)        # (tq, d_k)

    k_t = k_cache[pl.ds(row, tk), :]                          # (tk, d_k) bf16
    v_t = v_cache[pl.ds(row, tk), :]                          # (tk, d_k) bf16

    # Scores for this (q-tile, kv-tile): f32 accumulation on the MXU.
    s = jax.lax.dot_general(q_sc[...], k_t, dn,
                            preferred_element_type=jnp.float32)   # (tq, tk)

    # Online softmax update (all f32).
    m_prev = m_sc[...]
    m_new = jnp.maximum(m_prev, jnp.max(s, axis=-1, keepdims=True))
    alpha = jnp.exp(m_prev - m_new)
    p = jnp.exp(s - m_new)
    l_sc[...] = alpha * l_sc[...] + jnp.sum(p, axis=-1, keepdims=True)
    acc_sc[...] = alpha * acc_sc[...] + jnp.dot(
        p.astype(v_t.dtype), v_t, preferred_element_type=jnp.float32)
    m_sc[...] = m_new

    # Last kv tile: normalize and emit this head's context tile.
    @pl.when(ki == nkv - 1)
    def _():
        ctx = acc_sc[...] * pl.reciprocal(l_sc[...], approx=True)
        ctx_ref[0] = ctx.astype(ctx_ref.dtype)


def _out_proj_kernel(ctx_ref, wo_ref, bo_ref, o_ref):
    h = pl.program_id(1)

    # Output block stays resident across the (innermost) head axis; init with
    # the bias and accumulate each head's contribution directly into it.
    @pl.when(h == 0)
    def _():
        o_ref[...] = jnp.broadcast_to(bo_ref[...], o_ref.shape).astype(o_ref.dtype)

    o_ref[...] += jnp.dot(ctx_ref[0], wo_ref[0],
                          preferred_element_type=jnp.float32)


def multi_head_self_attention(x, params, *, num_heads, tq=None, tk=None, tm=None,
                              vmem_limit_bytes=40 * 1024 * 1024):
    """x: (B, S, D).  params use the PyTorch nn.Linear layout:
       wq/wk/wv/wo: (out_features, in_features) = (D, D);  bq/bk/bv/bo: (D,)."""
    B, S, D = x.shape
    assert D % num_heads == 0
    H = num_heads
    d_k = D // H
    scale = 1.0 / math.sqrt(d_k)

    if tq is None:
        tq = math.gcd(S, 128)
    if tk is None:
        tk = math.gcd(S, 256)
    assert S % tq == 0 and S % tk == 0
    nq, nkv = S // tq, S // tk

    cdt = jnp.bfloat16  # MXU-native compute dtype for x and weights
    xc = x.astype(cdt)

    # Head-major weight layouts (lane-dense per-head slices); scale folded into Q.
    wq = (params["wq"] * scale).reshape(H, d_k, D).astype(cdt)           # (H, d_k, D)
    bq = (params["bq"] * scale).reshape(H, 1, d_k).astype(jnp.float32)
    wkv = jnp.concatenate(
        [params["wk"].reshape(H, d_k, D),
         params["wv"].reshape(H, d_k, D)], axis=1).astype(cdt)           # (H, 2*d_k, D)
    bkv = jnp.concatenate(
        [params["bk"].reshape(H, 1, d_k),
         params["bv"].reshape(H, 1, d_k)], axis=2).astype(jnp.float32)   # (H, 1, 2*d_k)
    wo = params["wo"].reshape(D, H, d_k).transpose(1, 2, 0).astype(cdt)  # (H, d_k, D)
    bo = params["bo"].reshape(1, D).astype(jnp.float32)

    # ---------- Stage 1: per-head Q/KV projection + flash attention ----------
    xq_spec = pl.BlockSpec((1, tq, D), lambda b, h, qi, ki: (b, qi, 0))
    # x for K/V is only needed while qi == 0 (cache fill); afterwards the block
    # index collapses to a constant so the tile is not re-fetched every step.
    xkv_spec = pl.BlockSpec(
        (1, tk, D), lambda b, h, qi, ki: (b, jnp.where(qi == 0, ki, 0), 0))
    wq_spec = pl.BlockSpec((1, d_k, D), lambda b, h, qi, ki: (h, 0, 0))
    bq_spec = pl.BlockSpec((1, 1, d_k), lambda b, h, qi, ki: (h, 0, 0))
    wkv_spec = pl.BlockSpec((1, 2 * d_k, D), lambda b, h, qi, ki: (h, 0, 0))
    bkv_spec = pl.BlockSpec((1, 1, 2 * d_k), lambda b, h, qi, ki: (h, 0, 0))
    ctx_spec = pl.BlockSpec((1, tq, d_k), lambda b, h, qi, ki: (h, b * nq + qi, 0))

    flash = pl.pallas_call(
        functools.partial(_flash_proj_kernel, tk=tk, d_k=d_k),
        out_shape=jax.ShapeDtypeStruct((H, B * S, d_k), cdt),
        grid_spec=pltpu.PrefetchScalarGridSpec(
            num_scalar_prefetch=0,
            grid=(B, H, nq, nkv),
            in_specs=[xq_spec, xkv_spec, wq_spec, bq_spec, wkv_spec, bkv_spec],
            out_specs=ctx_spec,
            scratch_shapes=[
                pltpu.VMEM((tq, d_k), cdt),           # cached per-(b,h,q-tile) Q
                pltpu.VMEM((S, d_k), cdt),            # per-(b,h) K cache
                pltpu.VMEM((S, d_k), cdt),            # per-(b,h) V cache
                pltpu.VMEM((tq, 1), jnp.float32),     # running max m
                pltpu.VMEM((tq, 1), jnp.float32),     # running denom l
                pltpu.VMEM((tq, d_k), jnp.float32),   # context accumulator
            ]),
        compiler_params=pltpu.CompilerParams(
            dimension_semantics=("parallel", "parallel", "arbitrary", "arbitrary"),
            vmem_limit_bytes=vmem_limit_bytes),
    )
    ctx = flash(xc, xc, wq, bq, wkv, bkv)             # (H, B*S, d_k) bf16

    # ---------- Stage 2: output projection  out = sum_h ctx_h @ Wo_h + bo ----
    R = B * S
    if tm is None:
        tm = math.gcd(R, 512)
    assert R % tm == 0

    out_proj = pl.pallas_call(
        _out_proj_kernel,
        out_shape=jax.ShapeDtypeStruct((R, D), jnp.float32),
        grid_spec=pltpu.PrefetchScalarGridSpec(
            num_scalar_prefetch=0,
            grid=(R // tm, H),
            in_specs=[
                pl.BlockSpec((1, tm, d_k), lambda r, h: (h, r, 0)),
                pl.BlockSpec((1, d_k, D), lambda r, h: (h, 0, 0)),
                pl.BlockSpec((1, D), lambda r, h: (0, 0)),
            ],
            out_specs=pl.BlockSpec((tm, D), lambda r, h: (r, 0))),
        compiler_params=pltpu.CompilerParams(
            dimension_semantics=("parallel", "arbitrary"),
            vmem_limit_bytes=vmem_limit_bytes),
    )
    out = out_proj(ctx, wo, bo)                       # (B*S, D) f32
    return out.reshape(B, S, D)


def reference_mhsa(x, params, *, num_heads):
    """Pure-JAX f32 reference mirroring the PyTorch forward (mask=None)."""
    B, S, D = x.shape
    d_k = D // num_heads
    q = x @ params["wq"].T + params["bq"]
    k = x @ params["wk"].T + params["bk"]
    v = x @ params["wv"].T + params["bv"]

    def split(t):  # (B,S,D) -> (B,H,S,d_k)
        return t.reshape(B, S, num_heads, d_k).transpose(0, 2, 1, 3)

    q, k, v = split(q), split(k), split(v)
    scores = jnp.einsum('bhqd,bhkd->bhqk', q, k) / math.sqrt(d_k)
    attn = jax.nn.softmax(scores, axis=-1)
    out = jnp.einsum('bhqk,bhkd->bhqd', attn, v)
    out = out.transpose(0, 2, 1, 3).reshape(B, S, D)
    return out @ params["wo"].T + params["bo"]


def init_params(key, d_model):
    """Deterministic init mimicking nn.Linear: uniform(-1/sqrt(fan_in), +).
       Weights stored PyTorch-native as (out_features, in_features)."""
    keys = jax.random.split(key, 8)
    bound = 1.0 / math.sqrt(d_model)

    def w(k):
        return jax.random.uniform(k, (d_model, d_model), jnp.float32, -bound, bound)

    def b(k):
        return jax.random.uniform(k, (d_model,), jnp.float32, -bound, bound)

    return {
        "wq": w(keys[0]), "bq": b(keys[1]),
        "wk": w(keys[2]), "bk": b(keys[3]),
        "wv": w(keys[4]), "bv": b(keys[5]),
        "wo": w(keys[6]), "bo": b(keys[7]),
    }


if __name__ == "__main__":
    B, S, D, H = 2, 8, 32, 4   # batch, seq, d_model, num_heads (d_k = 8)
    key = jax.random.PRNGKey(0)
    kx, kp = jax.random.split(key)
    x = jax.random.normal(kx, (B, S, D), jnp.float32)
    params = init_params(kp, D)

    out = multi_head_self_attention(x, params, num_heads=H)
    out = jax.block_until_ready(out)

    ref = reference_mhsa(x, params, num_heads=H)
    assert out.shape == (B, S, D)
    max_err = float(jnp.max(jnp.abs(out - ref)))
    # bf16 matmul operands + bf16 context intermediate + approx reciprocal
    # -> loosened tolerance vs the f32 reference.
    assert jnp.allclose(out, ref, atol=3e-2, rtol=3e-2), f"mismatch: max|err|={max_err}"

    print("KERNEL_OK")
</pallas_src>

<mosaic_0001>
module attributes {stable_mosaic.version = 11 : i64} {
  func.func @_flash_proj_kernel(%arg0: i32, %arg1: i32, %arg2: i32, %arg3: i32, %arg4: memref<1x8x32xbf16, #tpu.memory_space<vmem>>, %arg5: memref<1x8x32xbf16, #tpu.memory_space<vmem>>, %arg6: memref<1x8x32xbf16, #tpu.memory_space<vmem>>, %arg7: memref<1x1x8xf32, #tpu.memory_space<vmem>>, %arg8: memref<1x16x32xbf16, #tpu.memory_space<vmem>>, %arg9: memref<1x1x16xf32, #tpu.memory_space<vmem>>, %arg10: memref<1x8x8xbf16, #tpu.memory_space<vmem>>, %arg11: memref<8x8xbf16, #tpu.memory_space<vmem>>, %arg12: memref<8x8xbf16, #tpu.memory_space<vmem>>, %arg13: memref<8x8xbf16, #tpu.memory_space<vmem>>, %arg14: memref<8x1xf32, #tpu.memory_space<vmem>>, %arg15: memref<8x1xf32, #tpu.memory_space<vmem>>, %arg16: memref<8x8xf32, #tpu.memory_space<vmem>>) attributes {dimension_semantics = [#tpu.dimension_semantics<parallel>, #tpu.dimension_semantics<parallel>, #tpu.dimension_semantics<arbitrary>, #tpu.dimension_semantics<arbitrary>], iteration_bounds = array<i64: 2, 4, 1, 1>, scalar_prefetch = 0 : i64, scratch_operands = 6 : i64, tpu.core_type = #tpu.core_type<tc>, window_params = [{transform_indices = @transform_0, window_bounds = array<i64: 1, 8, 32>}, {transform_indices = @transform_1, window_bounds = array<i64: 1, 8, 32>}, {transform_indices = @transform_2, window_bounds = array<i64: 1, 8, 32>}, {transform_indices = @transform_3, window_bounds = array<i64: 1, 1, 8>}, {transform_indices = @transform_4, window_bounds = array<i64: 1, 16, 32>}, {transform_indices = @transform_5, window_bounds = array<i64: 1, 1, 16>}, {transform_indices = @transform_6, window_bounds = array<i64: 1, 8, 8>}]} {
    %c8_i32 = arith.constant 8 : i32
    %0 = arith.muli %arg3, %c8_i32 : i32
    %1 = tpu.assume_multiple %0, 8 : i32
    %c0_i32 = arith.constant 0 : i32
    %2 = arith.cmpi eq, %arg2, %c0_i32 : i32
    %3 = arith.extui %2 : i1 to i32
    %c0_i32_0 = arith.constant 0 : i32
    %4 = arith.cmpi ne, %3, %c0_i32_0 : i32
    scf.if %4 {
      %c0_23 = arith.constant 0 : index
      %c0_24 = arith.constant 0 : index
      %c0_25 = arith.constant 0 : index
      %40 = vector.load %arg5[%c0_23, %c0_24, %c0_25] : memref<1x8x32xbf16, #tpu.memory_space<vmem>>, vector<1x8x32xbf16>
      %41 = vector.shape_cast %40 : vector<1x8x32xbf16> to vector<8x32xbf16>
      %c0_26 = arith.constant 0 : index
      %c0_27 = arith.constant 0 : index
      %c0_28 = arith.constant 0 : index
      %42 = vector.load %arg8[%c0_26, %c0_27, %c0_28] : memref<1x16x32xbf16, #tpu.memory_space<vmem>>, vector<1x16x32xbf16>
      %43 = vector.shape_cast %42 : vector<1x16x32xbf16> to vector<16x32xbf16>
      %cst_29 = arith.constant dense<0.000000e+00> : vector<8x16xf32>
      %44 = tpu.matmul %41, %43, %cst_29 {dimension_numbers = #tpu.dot_dimension_numbers<[1], [1], [0], [0], [0, 0, 1, 0], [], []>} : vector<8x32xbf16>, vector<16x32xbf16>, vector<8x16xf32> -> vector<8x16xf32>
      %c0_30 = arith.constant 0 : index
      %c0_31 = arith.constant 0 : index
      %c0_32 = arith.constant 0 : index
      %45 = vector.load %arg9[%c0_30, %c0_31, %c0_32] : memref<1x1x16xf32, #tpu.memory_space<vmem>>, vector<1x1x16xf32>
      %46 = vector.shape_cast %45 : vector<1x1x16xf32> to vector<1x16xf32>
      %47 = vector.broadcast %46 : vector<1x16xf32> to vector<8x16xf32>
      %48 = arith.addf %44, %47 : vector<8x16xf32>
      %49 = arith.truncf %48 : vector<8x16xf32> to vector<8x16xbf16>
      %50 = vector.extract_strided_slice %49 {offsets = [0, 0], sizes = [8, 8], strides = [1, 1]} : vector<8x16xbf16> to vector<8x8xbf16>
      %51 = arith.index_cast %1 : i32 to index
      %c0_33 = arith.constant 0 : index
      %52 = vector.load %arg12[%51, %c0_33] : memref<8x8xbf16, #tpu.memory_space<vmem>>, vector<8x8xbf16>
      tpu.vector_store %arg12[%51, %c0_33], %50 {strides = array<i32>} : memref<8x8xbf16, #tpu.memory_space<vmem>>, vector<8x8xbf16>,
      %53 = vector.extract_strided_slice %49 {offsets = [0, 8], sizes = [8, 8], strides = [1, 1]} : vector<8x16xbf16> to vector<8x8xbf16>
      %54 = arith.index_cast %1 : i32 to index
      %c0_34 = arith.constant 0 : index
      %55 = vector.load %arg13[%54, %c0_34] : memref<8x8xbf16, #tpu.memory_space<vmem>>, vector<8x8xbf16>
      tpu.vector_store %arg13[%54, %c0_34], %53 {strides = array<i32>} : memref<8x8xbf16, #tpu.memory_space<vmem>>, vector<8x8xbf16>,
    } else {
    }
    %c0_i32_1 = arith.constant 0 : i32
    %5 = arith.cmpi eq, %arg3, %c0_i32_1 : i32
    %6 = arith.extui %5 : i1 to i32
    %c0_i32_2 = arith.constant 0 : i32
    %7 = arith.cmpi ne, %6, %c0_i32_2 : i32
    scf.if %7 {
      %cst_23 = arith.constant 0xFF800000 : f32
      %40 = vector.broadcast %cst_23 : f32 to vector<8x1xf32>
      %c0_24 = arith.constant 0 : index
      %c0_25 = arith.constant 0 : index
      %41 = vector.load %arg14[%c0_24, %c0_25] : memref<8x1xf32, #tpu.memory_space<vmem>>, vector<8x1xf32>
      tpu.vector_store %arg14[%c0_24, %c0_25], %40 {strides = array<i32>} : memref<8x1xf32, #tpu.memory_space<vmem>>, vector<8x1xf32>,
      %cst_26 = arith.constant 0.000000e+00 : f32
      %42 = vector.broadcast %cst_26 : f32 to vector<8x1xf32>
      %c0_27 = arith.constant 0 : index
      %c0_28 = arith.constant 0 : index
      %43 = vector.load %arg15[%c0_27, %c0_28] : memref<8x1xf32, #tpu.memory_space<vmem>>, vector<8x1xf32>
      tpu.vector_store %arg15[%c0_27, %c0_28], %42 {strides = array<i32>} : memref<8x1xf32, #tpu.memory_space<vmem>>, vector<8x1xf32>,
      %cst_29 = arith.constant 0.000000e+00 : f32
      %44 = vector.broadcast %cst_29 : f32 to vector<8x8xf32>
      %c0_30 = arith.constant 0 : index
      %c0_31 = arith.constant 0 : index
      %45 = vector.load %arg16[%c0_30, %c0_31] : memref<8x8xf32, #tpu.memory_space<vmem>>, vector<8x8xf32>
      tpu.vector_store %arg16[%c0_30, %c0_31], %44 {strides = array<i32>} : memref<8x8xf32, #tpu.memory_space<vmem>>, vector<8x8xf32>,
      %c0_32 = arith.constant 0 : index
      %c0_33 = arith.constant 0 : index
      %c0_34 = arith.constant 0 : index
      %46 = vector.load %arg4[%c0_32, %c0_33, %c0_34] : memref<1x8x32xbf16, #tpu.memory_space<vmem>>, vector<1x8x32xbf16>
      %47 = vector.shape_cast %46 : vector<1x8x32xbf16> to vector<8x32xbf16>
      %c0_35 = arith.constant 0 : index
      %c0_36 = arith.constant 0 : index
      %c0_37 = arith.constant 0 : index
      %48 = vector.load %arg6[%c0_35, %c0_36, %c0_37] : memref<1x8x32xbf16, #tpu.memory_space<vmem>>, vector<1x8x32xbf16>
      %49 = vector.shape_cast %48 : vector<1x8x32xbf16> to vector<8x32xbf16>
      %cst_38 = arith.constant dense<0.000000e+00> : vector<8x8xf32>
      %50 = tpu.matmul %47, %49, %cst_38 {dimension_numbers = #tpu.dot_dimension_numbers<[1], [1], [0], [0], [0, 0, 1, 0], [], []>} : vector<8x32xbf16>, vector<8x32xbf16>, vector<8x8xf32> -> vector<8x8xf32>
      %c0_39 = arith.constant 0 : index
      %c0_40 = arith.constant 0 : index
      %c0_41 = arith.constant 0 : index
      %51 = vector.load %arg7[%c0_39, %c0_40, %c0_41] : memref<1x1x8xf32, #tpu.memory_space<vmem>>, vector<1x1x8xf32>
      %52 = vector.shape_cast %51 : vector<1x1x8xf32> to vector<1x8xf32>
      %53 = vector.broadcast %52 : vector<1x8xf32> to vector<8x8xf32>
      %54 = arith.addf %50, %53 : vector<8x8xf32>
      %55 = arith.truncf %54 : vector<8x8xf32> to vector<8x8xbf16>
      %c0_42 = arith.constant 0 : index
      %c0_43 = arith.constant 0 : index
      %56 = vector.load %arg11[%c0_42, %c0_43] : memref<8x8xbf16, #tpu.memory_space<vmem>>, vector<8x8xbf16>
      tpu.vector_store %arg11[%c0_42, %c0_43], %55 {strides = array<i32>} : memref<8x8xbf16, #tpu.memory_space<vmem>>, vector<8x8xbf16>,
    } else {
    }
    %8 = arith.index_cast %1 : i32 to index
    %c0 = arith.constant 0 : index
    %9 = vector.load %arg12[%8, %c0] : memref<8x8xbf16, #tpu.memory_space<vmem>>, vector<8x8xbf16>
    %10 = arith.index_cast %1 : i32 to index
    %c0_3 = arith.constant 0 : index
    %11 = vector.load %arg13[%10, %c0_3] : memref<8x8xbf16, #tpu.memory_space<vmem>>, vector<8x8xbf16>
    %c0_4 = arith.constant 0 : index
    %c0_5 = arith.constant 0 : index
    %12 = vector.load %arg11[%c0_4, %c0_5] : memref<8x8xbf16, #tpu.memory_space<vmem>>, vector<8x8xbf16>
    %cst = arith.constant dense<0.000000e+00> : vector<8x8xf32>
    %13 = tpu.matmul %12, %9, %cst {dimension_numbers = #tpu.dot_dimension_numbers<[1], [1], [0], [0], [0, 0, 1, 0], [], []>} : vector<8x8xbf16>, vector<8x8xbf16>, vector<8x8xf32> -> vector<8x8xf32>
    %c0_6 = arith.constant 0 : index
    %c0_7 = arith.constant 0 : index
    %14 = vector.load %arg14[%c0_6, %c0_7] : memref<8x1xf32, #tpu.memory_space<vmem>>, vector<8x1xf32>
    %cst_8 = arith.constant dense<0xFF800000> : vector<8xf32>
    %15 = vector.multi_reduction <maximumf>, %13, %cst_8 [1] : vector<8x8xf32> to vector<8xf32>
    %16 = vector.shape_cast %15 : vector<8xf32> to vector<8x1xf32>
    %17 = arith.maximumf %14, %16 : vector<8x1xf32>
    %18 = arith.subf %14, %17 : vector<8x1xf32>
    %19 = math.exp %18 : vector<8x1xf32>
    %20 = vector.broadcast %17 : vector<8x1xf32> to vector<8x8xf32>
    %21 = arith.subf %13, %20 : vector<8x8xf32>
    %22 = math.exp %21 : vector<8x8xf32>
    %c0_9 = arith.constant 0 : index
    %c0_10 = arith.constant 0 : index
    %23 = vector.load %arg15[%c0_9, %c0_10] : memref<8x1xf32, #tpu.memory_space<vmem>>, vector<8x1xf32>
    %24 = arith.mulf %19, %23 : vector<8x1xf32>
    %cst_11 = arith.constant dense<0.000000e+00> : vector<8xf32>
    %25 = vector.multi_reduction <add>, %22, %cst_11 [1] : vector<8x8xf32> to vector<8xf32>
    %26 = vector.shape_cast %25 : vector<8xf32> to vector<8x1xf32>
    %27 = arith.addf %24, %26 : vector<8x1xf32>
    %c0_12 = arith.constant 0 : index
    %c0_13 = arith.constant 0 : index
    %28 = vector.load %arg15[%c0_12, %c0_13] : memref<8x1xf32, #tpu.memory_space<vmem>>, vector<8x1xf32>
    tpu.vector_store %arg15[%c0_12, %c0_13], %27 {strides = array<i32>} : memref<8x1xf32, #tpu.memory_space<vmem>>, vector<8x1xf32>,
    %c0_14 = arith.constant 0 : index
    %c0_15 = arith.constant 0 : index
    %29 = vector.load %arg16[%c0_14, %c0_15] : memref<8x8xf32, #tpu.memory_space<vmem>>, vector<8x8xf32>
    %30 = vector.broadcast %19 : vector<8x1xf32> to vector<8x8xf32>
    %31 = arith.mulf %30, %29 : vector<8x8xf32>
    %32 = arith.truncf %22 : vector<8x8xf32> to vector<8x8xbf16>
    %cst_16 = arith.constant dense<0.000000e+00> : vector<8x8xf32>
    %33 = tpu.matmul %32, %11, %cst_16 {dimension_numbers = #tpu.dot_dimension_numbers<[1], [0], [0], [1], [0, 0, 1, 1], [], []>} : vector<8x8xbf16>, vector<8x8xbf16>, vector<8x8xf32> -> vector<8x8xf32>
    %34 = arith.addf %31, %33 : vector<8x8xf32>
    %c0_17 = arith.constant 0 : index
    %c0_18 = arith.constant 0 : index
    %35 = vector.load %arg16[%c0_17, %c0_18] : memref<8x8xf32, #tpu.memory_space<vmem>>, vector<8x8xf32>
    tpu.vector_store %arg16[%c0_17, %c0_18], %34 {strides = array<i32>} : memref<8x8xf32, #tpu.memory_space<vmem>>, vector<8x8xf32>,
    %c0_19 = arith.constant 0 : index
    %c0_20 = arith.constant 0 : index
    %36 = vector.load %arg14[%c0_19, %c0_20] : memref<8x1xf32, #tpu.memory_space<vmem>>, vector<8x1xf32>
    tpu.vector_store %arg14[%c0_19, %c0_20], %17 {strides = array<i32>} : memref<8x1xf32, #tpu.memory_space<vmem>>, vector<8x1xf32>,
    %c0_i32_21 = arith.constant 0 : i32
    %37 = arith.cmpi eq, %arg3, %c0_i32_21 : i32
    %38 = arith.extui %37 : i1 to i32
    %c0_i32_22 = arith.constant 0 : i32
    %39 = arith.cmpi ne, %38, %c0_i32_22 : i32
    scf.if %39 {
      %c0_23 = arith.constant 0 : index
      %c0_24 = arith.constant 0 : index
      %40 = vector.load %arg16[%c0_23, %c0_24] : memref<8x8xf32, #tpu.memory_space<vmem>>, vector<8x8xf32>
      %c0_25 = arith.constant 0 : index
      %c0_26 = arith.constant 0 : index
      %41 = vector.load %arg15[%c0_25, %c0_26] : memref<8x1xf32, #tpu.memory_space<vmem>>, vector<8x1xf32>
      %42 = tpu.reciprocal %41 {approx = true} : vector<8x1xf32> -> vector<8x1xf32>
      %43 = vector.broadcast %42 : vector<8x1xf32> to vector<8x8xf32>
      %44 = arith.mulf %40, %43 : vector<8x8xf32>
      %45 = arith.truncf %44 : vector<8x8xf32> to vector<8x8xbf16>
      %c0_27 = arith.constant 0 : index
      %c0_28 = arith.constant 0 : index
      %c0_29 = arith.constant 0 : index
      %46 = vector.load %arg10[%c0_27, %c0_28, %c0_29] : memref<1x8x8xbf16, #tpu.memory_space<vmem>>, vector<1x8x8xbf16>
      %47 = vector.shape_cast %46 : vector<1x8x8xbf16> to vector<8x8xbf16>
      %48 = vector.shape_cast %45 : vector<8x8xbf16> to vector<1x8x8xbf16>
      tpu.vector_store %arg10[%c0_27, %c0_28, %c0_29], %48 {strides = array<i32>} : memref<1x8x8xbf16, #tpu.memory_space<vmem>>, vector<1x8x8xbf16>,
    } else {
    }
    return
  }
  func.func @transform_0(%arg0: i32, %arg1: i32, %arg2: i32, %arg3: i32) -> (i32, i32, i32) {
    %c0_i32 = arith.constant 0 : i32
    %c0_i32_0 = arith.constant 0 : i32
    return %arg0, %arg2, %c0_i32 : i32, i32, i32
  }
  func.func @transform_1(%arg0: i32, %arg1: i32, %arg2: i32, %arg3: i32) -> (i32, i32, i32) {
    %c0_i32 = arith.constant 0 : i32
    %0 = arith.cmpi eq, %arg2, %c0_i32 : i32
    %c0_i32_0 = arith.constant 0 : i32
    %1 = arith.select %0, %arg3, %c0_i32_0 : i32
    %c0_i32_1 = arith.constant 0 : i32
    %c0_i32_2 = arith.constant 0 : i32
    return %arg0, %1, %c0_i32_1 : i32, i32, i32
  }
  func.func @transform_2(%arg0: i32, %arg1: i32, %arg2: i32, %arg3: i32) -> (i32, i32, i32) {
    %c0_i32 = arith.constant 0 : i32
    %c0_i32_0 = arith.constant 0 : i32
    %c0_i32_1 = arith.constant 0 : i32
    return %arg1, %c0_i32, %c0_i32_0 : i32, i32, i32
  }
  func.func @transform_3(%arg0: i32, %arg1: i32, %arg2: i32, %arg3: i32) -> (i32, i32, i32) {
    %c0_i32 = arith.constant 0 : i32
    %c0_i32_0 = arith.constant 0 : i32
    %c0_i32_1 = arith.constant 0 : i32
    return %arg1, %c0_i32, %c0_i32_0 : i32, i32, i32
  }
  func.func @transform_4(%arg0: i32, %arg1: i32, %arg2: i32, %arg3: i32) -> (i32, i32, i32) {
    %c0_i32 = arith.constant 0 : i32
    %c0_i32_0 = arith.constant 0 : i32
    %c0_i32_1 = arith.constant 0 : i32
    return %arg1, %c0_i32, %c0_i32_0 : i32, i32, i32
  }
  func.func @transform_5(%arg0: i32, %arg1: i32, %arg2: i32, %arg3: i32) -> (i32, i32, i32) {
    %c0_i32 = arith.constant 0 : i32
    %c0_i32_0 = arith.constant 0 : i32
    %c0_i32_1 = arith.constant 0 : i32
    return %arg1, %c0_i32, %c0_i32_0 : i32, i32, i32
  }
  func.func @transform_6(%arg0: i32, %arg1: i32, %arg2: i32, %arg3: i32) -> (i32, i32, i32) {
    %c1_i32 = arith.constant 1 : i32
    %0 = arith.muli %arg0, %c1_i32 : i32
    %1 = arith.addi %0, %arg2 : i32
    %c0_i32 = arith.constant 0 : i32
    %c0_i32_0 = arith.constant 0 : i32
    return %arg1, %1, %c0_i32 : i32, i32, i32
  }
}

</mosaic_0001>

<bundles_post_ra>
// kernel: tpu_custom_call.1
= control target key start
LH: loop header
LB: loop body
LE: loop exit
PB: predicated region body
PF: predicated region fallthrough
CT: control target
= control target key end

     0   :  { %s1781_s0 = inlined_call_operand.hbm [shape: bf16[2,8,32], index: 0, kind: input, shape index: {}]   ;;  %s1782_s1 = inlined_call_operand.hbm [shape: bf16[2,8,32], index: 1, kind: input, shape index: {}]   ;;  %s1783_s2 = inlined_call_operand.hbm [shape: bf16[4,8,32], index: 2, kind: input, shape index: {}]   ;;  %s1784_s3 = inlined_call_operand.vmem [shape: f32[4,1,8], index: 3, kind: input, shape index: {}]   ;;  %s1785_s4 = inlined_call_operand.hbm [shape: bf16[4,16,32], index: 4, kind: input, shape index: {}]   ;;  %s1786_s5 = inlined_call_operand.vmem [shape: f32[4,1,16], index: 5, kind: input, shape index: {}]   ;;  %s1787_s6 = inlined_call_operand.vmem [shape: bf16[4,16,8], index: 6, kind: output, shape index: {}]  }
   0x1   :  { %1796 = sst [smem:[#allocation21_spill]] %s1781_s0 }
   0x2   :  { %1797 = sst [smem:[#allocation22_spill]] %s1782_s1 }
   0x3   :  { %1798 = sst [smem:[#allocation23_spill]] %s1783_s2 }
   0x4   :  { %1799 = sst [smem:[#allocation24_spill]] %s1787_s6 }
   0x5   :  { %11 = vsyncpa [#allocation9], 0 }
   0x6   :  { %13 = vsyncpa [#allocation9 + $0x1], 0 }
   0x7   :  { %14 = vsyncpa [#allocation11], 0 }
   0x8   :  { %16 = vsyncpa [#allocation11 + $0x1], 0 }
   0x9   :  { %17 = vsyncpa [#allocation14], 0 }
   0xa   :  { %19 = vsyncpa [#allocation14 + $0x1], 0  ;;  %s1421_s21 = smov 0   ;;  %s1423_s22 = smov 0  }
   0xb   :  { %s1425_s23 = smov 0   ;;  %s1427_s24 = smov 0  }
   0xc   :  { %s1429_s25 = smov 0   ;;  %s1431_s26 = smov 0  }
   0xd   :  { %s1433_s27 = smov 0   ;;  %s1435_s28 = smov 0  }
   0xe   :  { %s1437_s29 = smov 0   ;;  %s1439_s30 = smov 0  }
   0xf   :  { %s1441_s7 = smov 0  }
  0x10 LB: > { %1800 = sst [smem:[#allocation19_spill]] %s1361_s28  ;;  %s1788_s8 = sadd.s32 4294967295, %s1373_s7   ;;  %s1373_s7 = sphi %s1441_s7, %s25_s7   ;;  %s1369_s30 = sphi %s1439_s30, %s1833_s30   ;;  %s1365_s29 = sphi %s1437_s29, %s1832_s29   ;;  %s1361_s28 = sphi %s1435_s28, %s1831_s28   ;;  %s1357_s27 = sphi %s1433_s27, %s1830_s27   ;;  %s1353_s26 = sphi %s1431_s26, %s1829_s26   ;;  %s1349_s25 = sphi %s1429_s25, %s1828_s25   ;;  %s1345_s24 = sphi %s1427_s24, %s1827_s24   ;;  %s1341_s23 = sphi %s1425_s23, %s1826_s23   ;;  %s1337_s22 = sphi %s1423_s22, %s1825_s22   ;;  %s1333_s21 = sphi %s1421_s21, %s1824_s21  }
  0x11   : > { %p67_p0 = scmp.ne.s32.totalorder %s1353_s26, %s1349_s25  ;;  %p68_p1 = scmp.eq.s32.totalorder %s1373_s7, 0 }
  0x12   : > { %p73_p2 = scmp.ne.s32.totalorder %s1349_s25, %s1345_s24  ;;  %p74_p3 = scmp.eq.s32.totalorder %s1788_s8, 0 }
  0x13   : > { %p125_p4 = scmp.ne.s32.totalorder %s1341_s23, %s1337_s22  ;;  %p69_p5 = por %p68_p1, %p67_p0 }
  0x14   : > { %p131_p6 = scmp.ne.s32.totalorder %s1337_s22, %s1333_s21  ;;  %p1484_p7 = por %p74_p3, %p73_p2 }
  0x15   : > { %p127_p8 = por %p125_p4, %p68_p1  ;;  %p1046_p10 = scmp.lt.s32.totalorder %s1373_s7, 8 }
  0x16   : > { %s1801_s11 = scalar_select %p1484_p7, 1, 0 }
  0x17   : > { %p1488_p9 = por %p131_p6, %p74_p3  ;;  %s1789_s13 = sand.u32 1, %s1353_s26  }
  0x18   : > { %s1496_s14 = sshll.u32 %s1789_s13, 2  ;;  %s1790_s15 = sshll.u32 %s1369_s30, 6 }
  0x19   : > { %s1802_s12 = scalar_select %p1488_p9, 1, 0 }
  0x1a   : > { %p1499_p11 = pnand %p1046_p10, %p69_p5  ;;  %s282_s17 = sand.u32 1, %s1373_s7  }
  0x1b   : > { %s1804_s1 = sld [smem:[#allocation22_spill]]  ;;  %s286_s21 = scalar_lea.vmem [#allocation10], %s1496_s14 }
  0x1c   : > { %s296_s24 = sshll.u32 %s286_s21, 4  ;;  %p1512_p12 = pnand %p1046_p10, %p127_p8  ;;  %s1516_s24 = int_to_ptr.vmem [resolvable:$true] %s296_s24 }
  0x1d   : > { %s1519_s10 = scalar_lea.sflag [#allocation11], %s282_s17  ;;  %p1153_p1 = pneg %p1499_p11 }
  0x1e   : > { %s1805_s8 = scalar_select %p1512_p12, 1, 0 }
  0x21   : > { %s1509_s20 = scalar_lea.hbm %s1804_s1, %s1790_s15  ;;  %s1156_s21 = scalar_lea.hbm %s1804_s1, 128 }
  0x22   : > { %s1151_s9 = scalar_lea.hbm %s1509_s20, 64  ;;  %p1157_p4 = scmp.lt.u32.totalorder %s1509_s20, %s1804_s1 }
  0x23   : > { %p1152_p0 = scmp.ne.s32.totalorder %s1509_s20, %s1151_s9  ;;  %p1158_p5 = scmp.lt.u32.totalorder %s1156_s21, %s1151_s9 }
  0x24   : > { %p1160_p8 = scmp.lt.u32.totalorder %s1151_s9, %s1509_s20 }
  0x25   : > { %p1154_p2 = pnand %p1153_p1, %p1152_p0  ;;  %p1159_p6 = por %p1158_p5, %p1157_p4 }
  0x27   : > { %p1155_p3 = pneg %p1154_p2  ;;  %p1161_p10 = por %p1160_p8, %p1159_p6 }
  0x29   : > { %p1162_p13 = pnand %p1161_p10, %p1155_p3 }
  0x2b   : > { %1165 = shalt.err (!%p1162_p13)
}
  0x2c   : > { %s1166_s17 = scalar_lea.vmem %s1516_s24, 64  ;;  %s1375_s18 = smov [#allocation10]  }
  0x2d   : > { %p1167_p0 = scmp.ne.s32.totalorder %s1516_s24, %s1166_s17  ;;  %s1171_s19 = sshll.u32 %s1375_s18, 4  ;;  %s1172_s19 = int_to_ptr.vmem [resolvable:$false] %s1171_s19 }
  0x2e   : > { %s1173_s13 = scalar_lea.vmem %s1172_s19, 128  ;;  %p1174_p7 = scmp.lt.s32.totalorder %s1516_s24, %s1172_s19 }
  0x2f   : > { %p1169_p2 = pnand %p1167_p0, %p1153_p1  ;;  %p1175_p4 = scmp.lt.s32.totalorder %s1173_s13, %s1166_s17 }
  0x31   : > { %p1170_p9 = pneg %p1169_p2  ;;  %p1176_p5 = por %p1175_p4, %p1174_p7 }
  0x33   : > { %p1177_p6 = pnand %p1176_p5, %p1170_p9 }
  0x35   : > { %1180 = shalt.err (!%p1177_p6)
}
  0x36   : > { %1039 = dma.hbm_to_vmem [thread:$0]  (!%p1499_p11), %s1509_s20, 64, %s1516_s24, %s1519_s10  }
  0x37   : > { %p352_p13 = scmp.lt.s32.totalorder %s1373_s7, 9  ;;  %p1806_p3 = scmp.ge.s32.totalorder %s1373_s7, 1 }
  0x38   : > { %s1808_s15 = sshll.u32 %s1369_s30, 6  ;;  %s1809_s0 = sld [smem:[#allocation21_spill]] }
  0x39   : > { %p1550_p8 = pnand %p1806_p3, %p352_p13  ;;  %s267_s19 = scalar_lea.vmem [#allocation8], %s1496_s14 }
  0x3a   : > { %s275_s13 = sshll.u32 %s267_s19, 4  ;;  %s1810_s20 = sand.u32 1, %s1353_s26   ;;  %s276_s13 = int_to_ptr.vmem [resolvable:$true] %s275_s13 }
  0x3b   : > { %s1807_s9 = scalar_select %p1550_p8, 1, 0 }
  0x3c   : > { %s264_s24 = scalar_lea.sflag [#allocation9], %s1810_s20 }
  0x3e   : > { %s1559_s18 = scalar_lea.hbm %s1809_s0, %s1808_s15  ;;  %s1186_s15 = scalar_lea.hbm %s1809_s0, 128 }
  0x3f   : > { %s1181_s1 = scalar_lea.hbm %s1559_s18, 64  ;;  %p1187_p0 = scmp.lt.u32.totalorder %s1559_s18, %s1809_s0 }
  0x40   : > { %p1182_p7 = scmp.ne.s32.totalorder %s1559_s18, %s1181_s1  ;;  %p1188_p2 = scmp.lt.u32.totalorder %s1186_s15, %s1181_s1 }
  0x41   : > { %p1190_p5 = scmp.lt.u32.totalorder %s1181_s1, %s1559_s18 }
  0x42   : > { %p1184_p9 = pnand %p1182_p7, %p1153_p1  ;;  %p1189_p4 = por %p1188_p2, %p1187_p0 }
  0x44   : > { %p1185_p10 = pneg %p1184_p9  ;;  %p1191_p6 = por %p1190_p5, %p1189_p4 }
  0x46   : > { %p1192_p13 = pnand %p1191_p6, %p1185_p10 }
  0x48   : > { %1195 = shalt.err (!%p1192_p13)
}
  0x49   : > { %s1196_s14 = scalar_lea.vmem %s276_s13, 64  ;;  %s1376_s19 = smov [#allocation8]  }
  0x4a   : > { %p1197_p3 = scmp.ne.s32.totalorder %s276_s13, %s1196_s14  ;;  %s1201_s6 = sshll.u32 %s1376_s19, 4  ;;  %s1202_s6 = int_to_ptr.vmem [resolvable:$false] %s1201_s6 }
  0x4b   : > { %s1203_s28 = scalar_lea.vmem %s1202_s6, 128  ;;  %p1204_p8 = scmp.lt.s32.totalorder %s276_s13, %s1202_s6 }
  0x4c   : > { %p1199_p7 = pnand %p1197_p3, %p1153_p1  ;;  %p1205_p12 = scmp.lt.s32.totalorder %s1203_s28, %s1196_s14 }
  0x4e   : > { %p1200_p9 = pneg %p1199_p7  ;;  %p1206_p0 = por %p1205_p12, %p1204_p8 }
  0x50   : > { %p1207_p2 = pnand %p1206_p0, %p1200_p9 }
  0x52   : > { %1210 = shalt.err (!%p1207_p2)
}
  0x53   : > { %1036 = dma.hbm_to_vmem [thread:$0]  (!%p1499_p11), %s1559_s18, 64, %s276_s13, %s264_s24  }
  0x54   : > { %s47_s1 = sadd.s32 1, %s1365_s29  ;;  %s118_s20 = sadd.s32 1, %s1341_s23 }
  0x55   : > { %p49_p1 = scmp.ge.s32.totalorder %s47_s1, 4  ;;  %s1586_s15 = sand.u32 1, %s1341_s23  }
  0x56   : > { %s969_s21 = sshll.u32 %s1586_s15, 2  ;;  %s970_s17 = sshll.u32 %s1365_s29, 6 }
  0x57   : > { %s1835_s1 = smov (%p49_p1, %s47_s1), 0  ;;  %s1811_s16 = sadd.s32 1, %s1369_s30 }
  0x58   : > { %s1837_s16 = smov (!%p49_p1, %s1811_s16), %s1369_s30  ;;  %s115_s14 = ssub.s32 %s1365_s29, %s1835_s1 }
  0x59   : > { %p53_p12 = scmp.ge.s32.totalorder %s1837_s16, 2  ;;  %p116_p11 = scmp.eq.s32.totalorder %s115_s14, 0 }
  0x5a   : > { %s1812_s2 = sld [smem:[#allocation23_spill]]  ;;  %s307_s19 = scalar_lea.vmem [#allocation12], %s969_s21 }
  0x5b   : > { %s314_s6 = sshll.u32 %s307_s19, 4  ;;  %s1839_s16 = smov (%p53_p12, %s1837_s16), 0  ;;  %s1609_s6 = int_to_ptr.vmem [resolvable:$true] %s314_s6 }
  0x5c   : > { %1813 = sst [smem:[#allocation20_spill]] %s1839_s16  ;;  %s55_s0 = ssub.s32 %s1369_s30, %s1839_s16 }
  0x5d   : > { %s1605_s28 = scalar_select %p116_p11, %s1341_s23, %s118_s20  }
  0x5e   : > { %p1611_p8 = scmp.eq.s32.totalorder %s55_s0, 0  ;;  %p1815_p4 = scmp.ne.s32.totalorder %s1805_s8, 0 }
  0x60   : > { %s1600_s24 = scalar_lea.hbm %s1812_s2, %s970_s17  ;;  %p1213_p5 = pneg %p1815_p4 }
  0x61   : > { %s1211_s17 = scalar_lea.hbm %s1600_s24, 64  ;;  %s1216_s20 = scalar_lea.hbm %s1812_s2, 256 }
  0x62   : > { %p1212_p10 = scmp.ne.s32.totalorder %s1600_s24, %s1211_s17  ;;  %p1217_p3 = scmp.lt.u32.totalorder %s1600_s24, %s1812_s2 }
  0x63   : > { %p1218_p7 = scmp.lt.u32.totalorder %s1216_s20, %s1211_s17  ;;  %p1220_p0 = scmp.lt.u32.totalorder %s1211_s17, %s1600_s24 }
  0x64   : > { %p1214_p6 = pnand %p1213_p5, %p1212_p10 }
  0x65   : > { %p1219_p9 = por %p1218_p7, %p1217_p3 }
  0x66   : > { %p1215_p13 = pneg %p1214_p6 }
  0x67   : > { %p1221_p2 = por %p1220_p0, %p1219_p9 }
  0x69   : > { %p1222_p1 = pnand %p1221_p2, %p1215_p13 }
  0x6b   : > { %1225 = shalt.err (!%p1222_p1)
}
  0x6c   : > { %s1226_s0 = scalar_lea.vmem %s1609_s6, 64  ;;  %s1377_s21 = smov [#allocation12]  }
  0x6d   : > { %p1227_p12 = scmp.ne.s32.totalorder %s1609_s6, %s1226_s0  ;;  %s1231_s18 = sshll.u32 %s1377_s21, 4  ;;  %s1232_s18 = int_to_ptr.vmem [resolvable:$false] %s1231_s18 }
  0x6e   : > { %s1233_s13 = scalar_lea.vmem %s1232_s18, 128  ;;  %p1234_p6 = scmp.lt.s32.totalorder %s1609_s6, %s1232_s18 }
  0x6f   : > { %p1229_p11 = pnand %p1227_p12, %p1213_p5  ;;  %p1235_p3 = scmp.lt.s32.totalorder %s1233_s13, %s1226_s0 }
  0x71   : > { %p1230_p10 = pneg %p1229_p11  ;;  %p1236_p7 = por %p1235_p3, %p1234_p6 }
  0x73   : > { %p1237_p9 = pnand %p1236_p7, %p1230_p10 }
  0x75   : > { %1240 = shalt.err (!%p1237_p9)
}
  0x76   : > { %1042 = dma.hbm_to_vmem [thread:$0]  (!%p1815_p4), %s1600_s24, 64, %s1609_s6, %s1519_s10  }
  0x77   : > { %s1816_s17 = sadd.s32 1, %s1353_s26  ;;  %s971_s19 = sshll.u32 %s1586_s15, 3 }
  0x78   : > { %s1646_s20 = scalar_select %p1611_p8, %s1353_s26, %s1816_s17  }
  0x79   : > { %s991_s0 = sshll.u32 %s1365_s29, 7  ;;  %s331_s2 = scalar_lea.vmem [#allocation13], %s971_s19 }
  0x7a   : > { %s1653_s13 = scalar_lea.hbm %s1785_s4, %s991_s0  ;;  %s338_s16 = sshll.u32 %s331_s2, 4  ;;  %s1655_s16 = int_to_ptr.vmem [resolvable:$true] %s338_s16 }
  0x7b   : > { %s328_s10 = scalar_lea.sflag [#allocation14], %s1586_s15  ;;  %s1241_s24 = scalar_lea.hbm %s1653_s13, 128 }
  0x7c   : > { %p1242_p13 = scmp.ne.s32.totalorder %s1653_s13, %s1241_s24  ;;  %s1246_s17 = scalar_lea.hbm %s1785_s4, 512 }
  0x7d   : > { %p1247_p2 = scmp.lt.u32.totalorder %s1653_s13, %s1785_s4  ;;  %p1248_p1 = scmp.lt.u32.totalorder %s1246_s17, %s1241_s24 }
  0x7e   : > { %p1244_p8 = pnand %p1242_p13, %p1213_p5  ;;  %p1250_p11 = scmp.lt.u32.totalorder %s1241_s24, %s1653_s13 }
  0x7f   : > { %p1249_p12 = por %p1248_p1, %p1247_p2 }
  0x80   : > { %p1245_p0 = pneg %p1244_p8 }
  0x81   : > { %p1251_p10 = por %p1250_p11, %p1249_p12 }
  0x83   : > { %p1252_p6 = pnand %p1251_p10, %p1245_p0 }
  0x85   : > { %1255 = shalt.err (!%p1252_p6)
}
  0x86   : > { %s1256_s2 = scalar_lea.vmem %s1655_s16, 128  ;;  %s1378_s19 = smov [#allocation13]  }
  0x87   : > { %p1257_p3 = scmp.ne.s32.totalorder %s1655_s16, %s1256_s2  ;;  %s1261_s18 = sshll.u32 %s1378_s19, 4  ;;  %s1262_s18 = int_to_ptr.vmem [resolvable:$false] %s1261_s18 }
  0x88   : > { %s1263_s6 = scalar_lea.vmem %s1262_s18, 256  ;;  %p1264_p13 = scmp.lt.s32.totalorder %s1655_s16, %s1262_s18 }
  0x89   : > { %p1259_p7 = pnand %p1257_p3, %p1213_p5  ;;  %p1265_p8 = scmp.lt.s32.totalorder %s1263_s6, %s1256_s2 }
  0x8b   : > { %p1260_p9 = pneg %p1259_p7  ;;  %p1266_p2 = por %p1265_p8, %p1264_p13 }
  0x8d   : > { %p1267_p1 = pnand %p1266_p2, %p1260_p9 }
  0x8f   : > { %1270 = shalt.err (!%p1267_p1)
}
  0x90   : > { %s1379_s24 = smov 64   ;;  %s1380_s14 = smov 4  }
  0x91   : > { %1045 = dma.hbm_to_vmem [thread:$0]  (!%p1815_p4), %s1653_s13, 128, %s1655_s16, %s328_s10, %s1379_s24, %s1379_s24, %s1380_s14  }
  0x92   : > { %p1817_p5 = scmp.ne.s32.totalorder %s1807_s9, 0 }
  0x93   : > { %s358_s17 = sand.u32 (!%p1817_p5), 1, %s1349_s25   ;;  %p1818_p0 = scmp.ne.s32.totalorder (!%p1817_p5), %s1801_s11, 0 }
  0x94   : > { %356 = sbr.rel (%p1817_p5) target bundleno = 1206 (0x4b6), region = 44  ;;  %s1686_s0 = sshll.u32 (!%p1817_p5), %s358_s17, 2 }
  0x95   : > { %s359_s21 = scalar_lea.sflag (!%p1817_p5), [#allocation9], %s358_s17  ;;  %s362_s2 = scalar_lea.vmem (!%p1817_p5), [#allocation8], %s1686_s0 }
  0x9b   : > { %1316 = dma.done.wait (%p1818_p0), %s359_s21, 64  }
  0x9c   : > { %1318 = vsyncadd (%p1818_p0), %s359_s21, 4294967232  ;;  %s1819_s8 = sadd.s32 4294967295, %s1373_s7   ;;  %s371_s16 = scalar_lea.vmem [#allocation10], %s1686_s0 }
  0x9d   : > { %s367_s15 = sand.u32 1, %s1819_s8  }
  0x9e   : > { %s368_s9 = scalar_lea.sflag [#allocation11], %s367_s15 }
  0x9f   : > { %1320 = dma.done.wait (%p1818_p0), %s368_s9, 64  }
  0xa0   : > { %1322 = vsyncadd (%p1818_p0), %s368_s9, 4294967232  ;;  %s378_s13 = sand.u32 1, %s1337_s22   ;;  %p1820_p4 = scmp.ne.s32.totalorder %s1802_s12, 0 }
  0xa1   : > { %s977_s10 = sshll.u32 %s378_s13, 2 }
  0xa2   : > { %s380_s19 = scalar_lea.vmem [#allocation12], %s977_s10 }
  0xa3   : > { %1324 = dma.done.wait (%p1820_p4), %s368_s9, 64  }
  0xa4   : > { %1326 = vsyncadd (%p1820_p4), %s368_s9, 4294967232  ;;  %s978_s18 = sshll.u32 %s378_s13, 3  ;;  %s386_s6 = scalar_lea.sflag [#allocation14], %s378_s13 }
  0xa5   : > { %s389_s24 = scalar_lea.vmem [#allocation13], %s978_s18 }
  0xa6   : > { %1328 = dma.done.wait (%p1820_p4), %s386_s6, 128  }
  0xa7   : > { %1330 = vsyncadd (%p1820_p4), %s386_s6, 4294967168  ;;  %v1381_v0 = vmov 0.0   ;;  %vm1382_vm0 = vmmov 0   ;;  %vm482_vm1 = vcmask 261120   ;;  %v1144_v1 = vld [vmem:[%s389_s24] sm:$0xff]   ;;  %vm552_vm2 = vcmask 64512  }
  0xa8   : > { %1001 = vmatprep.subr.bf16.mxu0 %v1381_v0  ;;  %1007 = vmatprep.subr.bf16.mxu1 %v1381_v0  ;;  %v555_v2 = vld [vmem:[%s380_s19] sm:$0xf]  ;;  %v487_v3 = vsel %vm482_vm1, %v1144_v1, 0  ;;  %v467_v5 = vld [vmem:[%s371_s16] sm:$0xf]  ;;  %553 = vst.msk [vmem:[#allocation7] sm:$0xff] %vm552_vm2, %v1381_v0 }
  0xa9   : > { %1003 = vmatprep.mubr.msk.bf16.mxu0 %vm1382_vm0, %v1381_v0  ;;  %1009 = vmatprep.mubr.msk.bf16.mxu1 %vm1382_vm0, %v1381_v0  ;;  %v568_v4 = vsel %vm482_vm1, %v555_v2, 0  ;;  %v554_v6 = vld [vmem:[%s362_s2] sm:$0xf]  ;;  %p445_p12 = scmp.lt.s32.totalorder %s1357_s27, 3  ;;  %vm534_vm3 = vcmask 60416   ;;  %s1383_s2 = smov 120  }
  0xaa   : > { %1002 = vmatpush3.bf16.xpose.msra.mxu0 %v487_v3  ;;  %1008 = vmatpush3.bf16.xpose.msra.mxu1 %v568_v4  ;;  %vm549_vm4 = vcmask 7168   ;;  %v1384_v24 = vmov -inf   ;;  %vm704_vm5 = vcmask 1043456   ;;  %v1385_v33 = vmov 0   ;;  %s1821_s8 = sld [smem:[#allocation19_spill]]  ;;  %s1822_s19 = sld [smem:[#allocation24_spill]] }
  0xab   : > { %1013 = vmatprep.subr.bf16.mxu0 %v1381_v0  ;;  %1019 = vmatprep.subr.bf16.mxu1 %v1381_v0  ;;  %s1841_s27 = smov (!%p445_p12, %s1357_s27), 3  ;;  %550 = vst.msk [vmem:[#allocation5] sm:$0xff] %vm549_vm4, %v1384_v24  ;;  %551 = vst.msk [vmem:[#allocation6] sm:$0xff] %vm549_vm4, %v1381_v0 }
  0xac   : > { %s450_s14 = scalar_lea.vmem %s1786_s5, %s1841_s27  ;;  %s447_s21 = scalar_lea.vmem %s1784_s3, %s1841_s27  ;;  %1142 = vset.pattern.permute.xlu0 %v1385_v33  ;;  %1143 = vset.pattern.permute.xlu1 %v1385_v33 }
  0xad   : > { %v981_v7 = vld [vmem:[%s450_s14] ss:$0 sm:$0xff]  ;;  %s979_s15 = sshll.u32 %s1841_s27, 1 }
  0xae   : > { %v985_v8 = vld [vmem:[%s447_s21] ss:$0 sm:$0xff] }
  0xaf   : > { %v693_v52 = vld [vmem:[#allocation7] sm:$0xff] }
  0xb0   : > { %p454_p11 = scmp.lt.s32.totalorder %s1821_s8, 1 }
  0xb1   : > { %1004 = vmatmul.mubr.msk.bf16.vlgmr.msra.gmra.mrb[0].mxu0 %vm482_vm1, %v467_v5  ;;  %1010 = vmatmul.mubr.msk.bf16.vlgmr.msra.gmra.mrb[0].mxu1 %vm482_vm1, %v554_v6 }
  0xb2   : > { %1015 = vmatprep.mubr.msk.bf16.mxu0 %vm1382_vm0, %v1381_v0  ;;  %1021 = vmatprep.mubr.msk.bf16.mxu1 %vm1382_vm0, %v1381_v0  ;;  %v669_v34 = vld [vmem:[#allocation5] sm:$0xff]  ;;  %v685_v46 = vld [vmem:[#allocation6] sm:$0xff]  ;;  %s1843_s8 = smov (!%p454_p11, %s1821_s8), 1 }
  0xb3   : > { %s457_s9 = sadd.s32 %s979_s15, %s1843_s8 }
  0xb4   : > { %s980_s16 = sshll.u32 %s457_s9, 2 }
  0xb5   : > { %s459_s18 = scalar_lea.vmem %s1822_s19, %s980_s16 }
 0x184   : > { %v523_v9 = vpop.f32.mrb[0].mxu0  ;;  %v604_v10 = vpop.f32.mrb[0].mxu1 }
 0x185   : > { %v524_v11 = vadd.f32 %v981_v7, %v523_v9  ;;  %v1005_v12 = vpop.f32.mrb[1].mxu0  ;;  %v605_v13 = vadd.f32 %v985_v8, %v604_v10  ;;  %v1011_v14 = vpop.f32.mrb[1].mxu1 }
 0x186   : > { %v526_v15 = vpop.f32.mrb[2].mxu0  ;;  %v607_v16 = vpop.f32.mrb[2].mxu1 }
 0x187   : > { %v529_v17 = vpack.c.bf16 %v524_v11, %v524_v11  ;;  %v1006_v18 = vpop.f32.mrb[3].mxu0  ;;  %v610_v19 = vpack.c.bf16 %v605_v13, %v605_v13  ;;  %v1012_v20 = vpop.f32.mrb[3].mxu1 }
 0x189   : > { %535 = vst.msk [vmem:[#allocation3] sm:$0xf] %vm534_vm3, %v529_v17  ;;  %539 = vrot.lane.b32.xlu1 %v529_v17, %s1383_s2  ;;  %612 = vst.msk [vmem:[#allocation2] sm:$0xf] %vm534_vm3, %v610_v19 }
 0x190   : > { %v617_v21 = vld [vmem:[#allocation3] sm:$0xf]  ;;  %v621_v23 = vld [vmem:[#allocation2] sm:$0xf] }
 0x191   : > { %v627_v22 = vsel %vm552_vm2, %v617_v21, 0 }
 0x192   : > { %1014 = vmatpush3.bf16.xpose.msra.mxu0 %v627_v22 }
 0x199   : > { %1016 = vmatmul.mubr.msk.bf16.vlgmr.msra.gmra.mrb[4].mxu0 %vm552_vm2, %v621_v23 }
 0x1fb   : > { %v540_v25 = vpop.permute.xlu1 %539 }
 0x1fc   : > { %544 = vst.msk [vmem:[#allocation4] sm:$0xf] %vm534_vm3, %v540_v25 }
 0x203   : > { %v620_v26 = vld [vmem:[#allocation4] sm:$0xf] }
 0x204   : > { %v706_v27 = vsel %vm704_vm5, %v620_v26, 0 }
 0x205   : > { %1020 = vmatpush3.bf16.msra.mxu1 %v706_v27 }
 0x26c   : > { %v663_v28 = vpop.f32.mrb[4].mxu0 }
 0x26d   : > { %v1017_v29 = vpop.f32.mrb[5].mxu0  ;;  %v670_v30 = vsel %vm552_vm2, %v663_v28, -inf }
 0x26e   : > { %671 = vmax.xlane.f32.xlu0 %v670_v30  ;;  %v666_v31 = vpop.f32.mrb[6].mxu0 }
 0x26f   : > { %v1018_v32 = vpop.f32.mrb[7].mxu0 }
 0x2fb   : > { %v672_v35 = vpop.xlane.xlu0 %671 }
 0x2fc   : > { %v673_v36 = vmax.f32 %v669_v34, %v672_v35 }
 0x2fe   : > { %v674_v37 = vsub.f32 %v669_v34, %v673_v36  ;;  %750 = vst.msk [vmem:[#allocation5] sm:$0xff] %vm549_vm4, %v673_v36  ;;  %679 = vperm.xlu0 %1142, %v673_v36  }
 0x300   : > { %v675_v44 = vmul.f32 1.442695, %v674_v37 }
 0x37d   : > { %v680_v38 = vpop.permute.xlu0 %679 }
 0x37e   : > { %v682_v39 = vsub.f32 %v663_v28, %v680_v38 }
 0x380   : > { %v683_v40 = vmul.f32 1.442695, %v682_v39 }
 0x382   : > { %1145 = vpow2.f32 %v683_v40 }
 0x383   : > { %1147 = vpow2.f32 %v675_v44 }
 0x38c   : > { %v1146_v41 = vpop.eup %1145 }
 0x38d   : > { %v687_v42 = vsel %vm552_vm2, %v1146_v41, 0.0  ;;  %v700_v43 = vpack.c.bf16 %v1146_v41, %v1146_v41  ;;  %v1148_v45 = vpop.eup %1147 }
 0x38e   : > { %688 = vadd.xlane.f32.xlu1 %v687_v42  ;;  %v686_v47 = vmul.f32 %v1148_v45, %v685_v46 }
 0x38f   : > { %1022 = vmatmul.mubr.msk.bf16.vlgmr.msra.gmra.mrb[4].mxu1 %vm552_vm2, %v700_v43 }
 0x39f   : > { %696 = vperm.xlu1 %1143, %v1148_v45  }
 0x41b   : > { %v689_v48 = vpop.xlane.xlu1 %688 }
 0x41c   : > { %v690_v49 = vadd.f32 %v689_v48, %v686_v47 }
 0x41e   : > { %692 = vst.msk [vmem:[#allocation6] sm:$0xff] %vm549_vm4, %v690_v49 }
 0x41f   : > { %v697_v53 = vpop.permute.xlu1 %696 }
 0x420   : > { %v699_v54 = vmul.f32 %v697_v53, %v693_v52 }
 0x425   : > { %v755_v50 = vld [vmem:[#allocation6] sm:$0xff] }
 0x426   : > { %1149 = vrcp.f32 %v755_v50 }
 0x430   : > { %v1150_v51 = vpop.eup %1149 }
 0x431   : > { %759 = vperm.xlu0 %1142, %v1150_v51  }
 0x462   : > { %v742_v55 = vpop.f32.mrb[4].mxu1 }
 0x463   : > { %v748_v56 = vadd.f32 %v742_v55, %v699_v54  ;;  %v1023_v57 = vpop.f32.mrb[5].mxu1 }
 0x464   : > { %v745_v58 = vpop.f32.mrb[6].mxu1 }
 0x465   : > { %749 = vst.msk [vmem:[#allocation7] sm:$0xff] %vm552_vm2, %v748_v56  ;;  %v1024_v59 = vpop.f32.mrb[7].mxu1 }
 0x46c   : > { %v754_v60 = vld [vmem:[#allocation7] sm:$0xff] }
 0x4b0   : > { %v760_v61 = vpop.permute.xlu0 %759 }
 0x4b1   : > { %v762_v62 = vmul.f32 %v760_v61, %v754_v60 }
 0x4b3   : > { %v763_v63 = vpack.c.bf16 %v762_v62, %v762_v62 }
 0x4b5   : > { %765 = vst.msk [vmem:[%s459_s18] sm:$0xf] %vm534_vm3, %v763_v63 }
 0x4b6 PF: > { %s25_s7 = sadd.s32 1, %s1373_s7   ;;  %s1823_s6 = sld [smem:[#allocation20_spill]] }
 0x4b7   : > { %p22_p10 = scmp.ge.s32.totalorder %s25_s7, 10   ;;  %s1824_s21 = smov %s1337_s22 }
 0x4b8   : > { %s1825_s22 = smov %s1341_s23  ;;  %s1826_s23 = smov %s1605_s28 }
 0x4b9   : > { %s1827_s24 = smov %s1349_s25  ;;  %s1828_s25 = smov %s1353_s26 }
 0x4ba   : > { %s1829_s26 = smov %s1646_s20  ;;  %s1830_s27 = smov %s1365_s29 }
 0x4bb   : > { %s1831_s28 = smov %s1369_s30  ;;  %s1832_s29 = smov %s1835_s1 }
 0x4bc   : > { %s1833_s30 = smov %s1823_s6  ;;  %24 = sbr.rel (!%p22_p10) target bundleno = 16 (0x10), region = 143 }
 0x4c3   :  { %796 = vsyncpa [#allocation9], 1 }
 0x4c4   :  { %798 = vsyncpa [#allocation9 + $0x1], 1 }
 0x4c5   :  { %799 = vsyncpa [#allocation11], 1 }
 0x4c6   :  { %801 = vsyncpa [#allocation11 + $0x1], 1 }
 0x4c7   :  { %802 = vsyncpa [#allocation14], 1 }
 0x4c8   :  { %804 = vsyncpa [#allocation14 + $0x1], 1 }

</bundles_post_ra>
